<compile_context>
chip_gen: v7x
topology: tpu7x:2x2x1
jax: 0.10.0
libtpu: 0.0.40
codegen_flags: <defaults>
</compile_context>

<pallas_src>
import jax
import jax.numpy as jnp
from jax import lax
from jax.experimental import pallas as pl
from jax.experimental.pallas import tpu as pltpu

LN_EPS = 1e-5  # PyTorch nn.LayerNorm default


# --------------------------------------------------------------------------
# Fused kernel: (input + positional embedding) -> LayerNorm(gamma, beta)
# --------------------------------------------------------------------------
def _posenc_ln_kernel(x_ref, pe_ref, g_ref, b_ref, o_ref):
    # x_ref : (1, S, H) block for one batch element
    # pe_ref: (S, H)    first-S rows of the embedding table (shared, constant block)
    # g_ref : (1, H)    LayerNorm gamma
    # b_ref : (1, H)    LayerNorm beta
    x = x_ref[0].astype(jnp.float32) + pe_ref[...].astype(jnp.float32)   # (S, H)
    mu = jnp.mean(x, axis=-1, keepdims=True)
    var = jnp.mean(jnp.square(x - mu), axis=-1, keepdims=True)
    y = (x - mu) * lax.rsqrt(var + LN_EPS)
    o_ref[0] = (y * g_ref[...] + b_ref[...]).astype(o_ref.dtype)
    # NOTE: nn.Dropout is identity in eval mode, so no RNG/masking here.


def trainable_positional_encoding(input_feat, pos_table, gamma, beta):
    """input_feat: (B, S, H); pos_table: (MAX_POS, H); gamma/beta: (1, H)."""
    B, S, H = input_feat.shape
    assert pos_table.shape[0] >= S and pos_table.shape[1] == H
    # (S, H) must be (8, 128)-tileable for the sliced table window.
    assert S % 8 == 0 and H % 128 == 0

    return pl.pallas_call(
        _posenc_ln_kernel,
        out_shape=jax.ShapeDtypeStruct((B, S, H), jnp.float32),
        grid=(B,),
        in_specs=[
            pl.BlockSpec((1, S, H), lambda b: (b, 0, 0)),   # per-batch input block
            pl.BlockSpec((S, H), lambda b: (0, 0)),         # rows [0, S) of the table
            pl.BlockSpec((1, H), lambda b: (0, 0)),         # gamma (resident)
            pl.BlockSpec((1, H), lambda b: (0, 0)),         # beta  (resident)
        ],
        out_specs=pl.BlockSpec((1, S, H), lambda b: (b, 0, 0)),
        compiler_params=pltpu.CompilerParams(
            dimension_semantics=("parallel",)),
    )(input_feat, pos_table, gamma, beta)


# --------------------------------------------------------------------------
# Pure-JAX reference (for in-script verification)
# --------------------------------------------------------------------------
def _reference(input_feat, pos_table, gamma, beta):
    S = input_feat.shape[1]
    x = input_feat + pos_table[:S][None]
    mu = jnp.mean(x, axis=-1, keepdims=True)
    var = jnp.mean(jnp.square(x - mu), axis=-1, keepdims=True)
    return (x - mu) / jnp.sqrt(var + LN_EPS) * gamma + beta


if __name__ == "__main__":
    key = jax.random.PRNGKey(0)
    kx, kp, kg, kb = jax.random.split(key, 4)

    B, S, H, MAX_POS = 2, 16, 256, 64
    input_feat = jax.random.normal(kx, (B, S, H), jnp.float32)
    pos_table = 0.02 * jax.random.normal(kp, (MAX_POS, H), jnp.float32)
    gamma = jnp.ones((1, H), jnp.float32) + 0.01 * jax.random.normal(kg, (1, H), jnp.float32)
    beta = 0.01 * jax.random.normal(kb, (1, H), jnp.float32)

    out = trainable_positional_encoding(input_feat, pos_table, gamma, beta)
    jax.block_until_ready(out)

    ref = _reference(input_feat, pos_table, gamma, beta)
    assert out.shape == (B, S, H)
    assert bool(jnp.all(jnp.isfinite(out)))
    assert bool(jnp.allclose(out, ref, rtol=1e-5, atol=1e-5))
    print("KERNEL_OK")
</pallas_src>

<mosaic_0001>
module attributes {stable_mosaic.version = 11 : i64} {
  func.func @_posenc_ln_kernel(%arg0: i32, %arg1: memref<1x16x256xf32, #tpu.memory_space<vmem>>, %arg2: memref<16x256xf32, #tpu.memory_space<vmem>>, %arg3: memref<1x256xf32, #tpu.memory_space<vmem>>, %arg4: memref<1x256xf32, #tpu.memory_space<vmem>>, %arg5: memref<1x16x256xf32, #tpu.memory_space<vmem>>) attributes {dimension_semantics = [#tpu.dimension_semantics<parallel>], iteration_bounds = array<i64: 2>, scalar_prefetch = 0 : i64, scratch_operands = 0 : i64, tpu.core_type = #tpu.core_type<tc>, window_params = [{transform_indices = @transform_0, window_bounds = array<i64: 1, 16, 256>}, {transform_indices = @transform_1, window_bounds = array<i64: 16, 256>}, {pipeline_mode = #tpu.pipeline_mode<synchronous>, transform_indices = @transform_2, window_bounds = array<i64: 1, 256>}, {pipeline_mode = #tpu.pipeline_mode<synchronous>, transform_indices = @transform_3, window_bounds = array<i64: 1, 256>}, {transform_indices = @transform_4, window_bounds = array<i64: 1, 16, 256>}]} {
    %c0 = arith.constant 0 : index
    %c0_0 = arith.constant 0 : index
    %c0_1 = arith.constant 0 : index
    %0 = vector.load %arg1[%c0, %c0_0, %c0_1] : memref<1x16x256xf32, #tpu.memory_space<vmem>>, vector<1x16x256xf32>
    %1 = vector.shape_cast %0 : vector<1x16x256xf32> to vector<16x256xf32>
    %c0_2 = arith.constant 0 : index
    %c0_3 = arith.constant 0 : index
    %2 = vector.load %arg2[%c0_2, %c0_3] : memref<16x256xf32, #tpu.memory_space<vmem>>, vector<16x256xf32>
    %3 = arith.addf %1, %2 : vector<16x256xf32>
    %cst = arith.constant dense<0.000000e+00> : vector<16xf32>
    %4 = vector.multi_reduction <add>, %3, %cst [1] : vector<16x256xf32> to vector<16xf32>
    %5 = vector.shape_cast %4 : vector<16xf32> to vector<16x1xf32>
    %cst_4 = arith.constant 2.560000e+02 : f32
    %6 = vector.broadcast %cst_4 : f32 to vector<16x1xf32>
    %7 = arith.divf %5, %6 : vector<16x1xf32>
    %8 = vector.broadcast %7 : vector<16x1xf32> to vector<16x256xf32>
    %9 = arith.subf %3, %8 : vector<16x256xf32>
    %10 = arith.mulf %9, %9 : vector<16x256xf32>
    %cst_5 = arith.constant dense<0.000000e+00> : vector<16xf32>
    %11 = vector.multi_reduction <add>, %10, %cst_5 [1] : vector<16x256xf32> to vector<16xf32>
    %12 = vector.shape_cast %11 : vector<16xf32> to vector<16x1xf32>
    %cst_6 = arith.constant 2.560000e+02 : f32
    %13 = vector.broadcast %cst_6 : f32 to vector<16x1xf32>
    %14 = arith.divf %12, %13 : vector<16x1xf32>
    %15 = vector.broadcast %7 : vector<16x1xf32> to vector<16x256xf32>
    %16 = arith.subf %3, %15 : vector<16x256xf32>
    %cst_7 = arith.constant 9.99999974E-6 : f32
    %17 = vector.broadcast %cst_7 : f32 to vector<16x1xf32>
    %18 = arith.addf %14, %17 : vector<16x1xf32>
    %19 = math.rsqrt %18 : vector<16x1xf32>
    %20 = vector.broadcast %19 : vector<16x1xf32> to vector<16x256xf32>
    %21 = arith.mulf %16, %20 : vector<16x256xf32>
    %c0_8 = arith.constant 0 : index
    %c0_9 = arith.constant 0 : index
    %22 = vector.load %arg3[%c0_8, %c0_9] : memref<1x256xf32, #tpu.memory_space<vmem>>, vector<1x256xf32>
    %23 = vector.broadcast %22 : vector<1x256xf32> to vector<16x256xf32>
    %24 = arith.mulf %21, %23 : vector<16x256xf32>
    %c0_10 = arith.constant 0 : index
    %c0_11 = arith.constant 0 : index
    %25 = vector.load %arg4[%c0_10, %c0_11] : memref<1x256xf32, #tpu.memory_space<vmem>>, vector<1x256xf32>
    %26 = vector.broadcast %25 : vector<1x256xf32> to vector<16x256xf32>
    %27 = arith.addf %24, %26 : vector<16x256xf32>
    %c0_12 = arith.constant 0 : index
    %c0_13 = arith.constant 0 : index
    %c0_14 = arith.constant 0 : index
    %28 = vector.load %arg5[%c0_12, %c0_13, %c0_14] : memref<1x16x256xf32, #tpu.memory_space<vmem>>, vector<1x16x256xf32>
    %29 = vector.shape_cast %28 : vector<1x16x256xf32> to vector<16x256xf32>
    %30 = vector.shape_cast %27 : vector<16x256xf32> to vector<1x16x256xf32>
    tpu.vector_store %arg5[%c0_12, %c0_13, %c0_14], %30 {strides = array<i32>} : memref<1x16x256xf32, #tpu.memory_space<vmem>>, vector<1x16x256xf32>,
    return
  }
  func.func @transform_0(%arg0: i32) -> (i32, i32, i32) {
    %c0_i32 = arith.constant 0 : i32
    %c0_i32_0 = arith.constant 0 : i32
    %c0_i32_1 = arith.constant 0 : i32
    return %arg0, %c0_i32, %c0_i32_0 : i32, i32, i32
  }
  func.func @transform_1(%arg0: i32) -> (i32, i32) {
    %c0_i32 = arith.constant 0 : i32
    %c0_i32_0 = arith.constant 0 : i32
    %c0_i32_1 = arith.constant 0 : i32
    return %c0_i32, %c0_i32_0 : i32, i32
  }
  func.func @transform_2(%arg0: i32) -> (i32, i32) {
    %c0_i32 = arith.constant 0 : i32
    %c0_i32_0 = arith.constant 0 : i32
    %c0_i32_1 = arith.constant 0 : i32
    return %c0_i32, %c0_i32_0 : i32, i32
  }
  func.func @transform_3(%arg0: i32) -> (i32, i32) {
    %c0_i32 = arith.constant 0 : i32
    %c0_i32_0 = arith.constant 0 : i32
    %c0_i32_1 = arith.constant 0 : i32
    return %c0_i32, %c0_i32_0 : i32, i32
  }
  func.func @transform_4(%arg0: i32) -> (i32, i32, i32) {
    %c0_i32 = arith.constant 0 : i32
    %c0_i32_0 = arith.constant 0 : i32
    %c0_i32_1 = arith.constant 0 : i32
    return %arg0, %c0_i32, %c0_i32_0 : i32, i32, i32
  }
}

</mosaic_0001>

<bundles_post_ra>
// kernel: tpu_custom_call.1
= control target key start
LH: loop header
LB: loop body
LE: loop exit
PB: predicated region body
PF: predicated region fallthrough
CT: control target
= control target key end

     0   :  { %9 = vsyncpa [#allocation3], 0  ;;  %s876_s0 = inlined_call_operand.hbm [shape: f32[2,16,256], index: 0, kind: input, shape index: {}]   ;;  %s877_s1 = inlined_call_operand.hbm [shape: f32[64,256], index: 1, kind: input, shape index: {}]   ;;  %s878_s2 = inlined_call_operand.vmem [shape: f32[1,256], index: 2, kind: input, shape index: {}]   ;;  %s879_s3 = inlined_call_operand.vmem [shape: f32[1,256], index: 3, kind: input, shape index: {}]   ;;  %s880_s4 = inlined_call_operand.hbm [shape: f32[2,16,256], index: 4, kind: output, shape index: {}]  }
   0x1   :  { %11 = vsyncpa [#allocation3 + $0x1], 0 }
   0x2   :  { %12 = vsyncpa [#allocation6], 0 }
   0x3   :  { %13 = vsyncpa [#allocation4], 0 }
   0x4   :  { %15 = vsyncpa [#allocation4 + $0x1], 0  ;;  %s654_s15 = smov 0   ;;  %s656_s16 = smov 0  }
   0x5   :  { %s658_s17 = smov 0   ;;  %s660_s18 = smov 0  }
   0x6 LB: > { %s675_s19 = sadd.s32 4294967295, %s620_s18   ;;  %s409_s20 = sadd.s32 4294967294, %s620_s18   ;;  %s620_s18 = sphi %s660_s18, %s900_s18   ;;  %s616_s17 = sphi %s658_s17, %s899_s17   ;;  %s612_s16 = sphi %s656_s16, %s898_s16   ;;  %s608_s15 = sphi %s654_s15, %s897_s15  }
   0x7   : > { %p41_p0 = scmp.ne.s32.totalorder %s612_s16, %s608_s15  ;;  %p881_p1 = scmp.eq.s32.totalorder %s675_s19, 0 }
   0x8   : > { %p134_p3 = scmp.eq.s32.totalorder %s409_s20, 1  ;;  %p410_p5 = scmp.ge.s32.totalorder %s620_s18, 1 }
   0x9   : > { %p684_p4 = por %p881_p1, %p41_p0  ;;  %p141_p7 = scmp.lt.s32.totalorder %s620_s18, 3 }
   0xa   : > { %p689_p6 = por %p134_p3, %p41_p0  ;;  %s622_s24 = smov [#allocation5]  }
   0xb   : > { %s884_s21 = scalar_select %p684_p4, 1, 0 }
   0xc   : > { %s885_s22 = scalar_select %p689_p6, 1, 0 }
   0xd   : > { %p694_p8 = pnand %p410_p5, %p141_p7  ;;  %s153_s25 = sshll.u32 %s622_s24, 4  ;;  %s698_s25 = int_to_ptr.vmem [resolvable:$true] %s153_s25 }
   0xe   : > { %s710_s27 = sadd.s32 1, %s620_s18   ;;  %s28_s28 = sadd.s32 1, %s616_s17 }
   0xf   : > { %s886_s23 = scalar_select %p694_p8, 1, 0 }
  0x10   : > { %p435_p9 = pneg %p694_p8  ;;  %s25_s29 = ssub.s32 %s620_s18, %s710_s27 }
  0x11   : > { %s492_s6 = scalar_lea.hbm %s877_s1, 512  ;;  %s497_s11 = scalar_lea.hbm %s877_s1, 2048 }
  0x12   : > { %p705_p11 = pnand %p435_p9, %p881_p1  ;;  %p493_p12 = scmp.ne.s32.totalorder %s877_s1, %s492_s6 }
  0x13   : > { %p498_p5 = scmp.lt.u32.totalorder %s497_s11, %s492_s6  ;;  %p499_p7 = scmp.lt.u32.totalorder %s492_s6, %s877_s1 }
  0x14   : > { %p494_p13 = pneg %p705_p11 }
  0x15   : > { %p500_p9 = por %p499_p7, %p498_p5 }
  0x16   : > { %p495_p0 = pnand %p494_p13, %p493_p12 }
  0x18   : > { %p496_p3 = pneg %p495_p0 }
  0x1a   : > { %p501_p10 = pnand %p500_p9, %p496_p3 }
  0x1c   : > { %504 = shalt.err (!%p501_p10)
}
  0x1d   : > { %s505_s14 = scalar_lea.vmem %s698_s25, 512  ;;  %p513_p0 = scmp.lt.s32.totalorder %s698_s25, %s698_s25 }
  0x1e   : > { %p506_p1 = scmp.ne.s32.totalorder %s698_s25, %s505_s14  ;;  %p514_p6 = scmp.lt.s32.totalorder %s505_s14, %s505_s14 }
  0x20   : > { %p508_p2 = pnand %p506_p1, %p494_p13  ;;  %p515_p4 = por %p514_p6, %p513_p0 }
  0x22   : > { %p509_p12 = pneg %p508_p2 }
  0x24   : > { %p516_p8 = pnand %p515_p4, %p509_p12 }
  0x26   : > { %519 = shalt.err (!%p516_p8)
}
  0x27   : > { %s623_s20 = smov 256   ;;  %s624_s24 = smov 16  }
  0x28   : > { %438 = dma.hbm_to_vmem [thread:$0]  (!%p705_p11), %s877_s1, 512, %s698_s25, [#allocation6], %s623_s20, %s623_s20, %s624_s24  }
  0x29   : > { %p26_p1 = scmp.eq.s32.totalorder %s25_s29, 0  ;;  %p35_p2 = scmp.ne.s32.totalorder %s616_s17, %s612_s16 }
  0x2a   : > { %p36_p4 = scmp.eq.s32.totalorder %s620_s18, 0  ;;  %p448_p6 = scmp.lt.s32.totalorder %s620_s18, 2 }
  0x2b   : > { %s749_s6 = scalar_select %p26_p1, %s616_s17, %s28_s28  }
  0x2c   : > { %p37_p8 = por %p36_p4, %p35_p2  ;;  %p888_p10 = scmp.eq.s32.totalorder %s675_s19, 1 }
  0x2d   : > { %s173_s26 = sand.u32 1, %s616_s17   ;;  %s425_s8 = sshll.u32 %s620_s18, 9 }
  0x2e   : > { %p753_p13 = por %p888_p10, %p35_p2  ;;  %s413_s9 = sshll.u32 %s173_s26, 5 }
  0x2f   : > { %s762_s25 = scalar_lea.hbm %s876_s0, %s425_s8  ;;  %s177_s28 = scalar_lea.vmem [#allocation2], %s413_s9 }
  0x30   : > { %s184_s29 = sshll.u32 %s177_s28, 4  ;;  %p764_p11 = pnand %p448_p6, %p37_p8  ;;  %s768_s29 = int_to_ptr.vmem [resolvable:$true] %s184_s29 }
  0x31   : > { %s770_s13 = scalar_lea.sflag [#allocation3], %s173_s26  ;;  %s520_s14 = scalar_lea.hbm %s762_s25, 512 }
  0x32   : > { %p521_p3 = scmp.ne.s32.totalorder %s762_s25, %s520_s14  ;;  %p522_p5 = pneg %p764_p11 }
  0x33   : > { %s525_s8 = scalar_lea.hbm %s876_s0, 1024  ;;  %p526_p12 = scmp.lt.u32.totalorder %s762_s25, %s876_s0 }
  0x34   : > { %p523_p7 = pnand %p522_p5, %p521_p3  ;;  %p527_p0 = scmp.lt.u32.totalorder %s525_s8, %s520_s14 }
  0x35   : > { %p529_p2 = scmp.lt.u32.totalorder %s520_s14, %s762_s25 }
  0x36   : > { %p524_p9 = pneg %p523_p7  ;;  %p528_p1 = por %p527_p0, %p526_p12 }
  0x38   : > { %p530_p4 = por %p529_p2, %p528_p1 }
  0x3a   : > { %p531_p6 = pnand %p530_p4, %p524_p9 }
  0x3c   : > { %534 = shalt.err (!%p531_p6)
}
  0x3d   : > { %s535_s26 = scalar_lea.vmem %s768_s29, 512  ;;  %s625_s11 = smov [#allocation2]  }
  0x3e   : > { %p536_p8 = scmp.ne.s32.totalorder %s768_s29, %s535_s26  ;;  %s540_s28 = sshll.u32 %s625_s11, 4  ;;  %s541_s28 = int_to_ptr.vmem [resolvable:$false] %s540_s28 }
  0x3f   : > { %s542_s30 = scalar_lea.vmem %s541_s28, 1024  ;;  %p543_p7 = scmp.lt.s32.totalorder %s768_s29, %s541_s28 }
  0x40   : > { %p538_p10 = pnand %p536_p8, %p522_p5  ;;  %p544_p12 = scmp.lt.s32.totalorder %s542_s30, %s535_s26 }
  0x42   : > { %p539_p3 = pneg %p538_p10  ;;  %p545_p0 = por %p544_p12, %p543_p7 }
  0x44   : > { %p546_p1 = pnand %p545_p0, %p539_p3 }
  0x46   : > { %549 = shalt.err (!%p546_p1)
}
  0x47   : > { %442 = dma.hbm_to_vmem [thread:$0]  (!%p764_p11), %s762_s25, 512, %s768_s29, %s770_s13, %s623_s20, %s623_s20, %s624_s24  }
  0x48   : > { %p891_p5 = scmp.ne.s32.totalorder %s886_s23, 0 }
  0x49   : > { %s804_s14 = sand.u32 (!%p891_p5), 1, %s612_s16   ;;  %p892_p9 = scmp.ne.s32.totalorder (!%p891_p5), %s884_s21, 0 }
  0x4a   : > { %196 = sbr.rel (%p891_p5) target bundleno = 423 (0x1a7), region = 36  ;;  %s417_s5 = sshll.u32 (!%p891_p5), %s804_s14, 5 }
  0x4b   : > { %s199_s8 = scalar_lea.sflag (!%p891_p5), [#allocation3], %s804_s14  ;;  %s202_s12 = scalar_lea.vmem (!%p891_p5), [#allocation2], %s417_s5 }
  0x51   : > { %595 = dma.done.wait (%p892_p9), %s199_s8, 512  }
  0x52   : > { %597 = vsyncadd (%p892_p9), %s199_s8, 4294966784  ;;  %p893_p11 = scmp.eq.s32.totalorder %s675_s19, 0 }
  0x54   : > { %599 = dma.done.wait (%p893_p11), [#allocation6], 512   ;;  %p894_p2 = pmov %p893_p11 }
  0x55   : > { %v231_v0 = vld [vmem:[%s202_s12] sm:$0xff]  ;;  %v232_v1 = vld [vmem:[%s202_s12 + $0x8] sm:$0xff]  ;;  %v233_v5 = vld [vmem:[%s202_s12 + $0x10] sm:$0xff]  ;;  %v278_v30 = vlaneseq  ;;  %s426_s25 = sshll.u32 %s675_s19, 9  ;;  %s230_s29 = scalar_lea.vmem [#allocation7], %s417_s5 }
  0x56   : > { %601 = vsyncadd (%p894_p2), [#allocation6], 4294966784  ;;  %v235_v2 = vld [vmem:[#allocation5] sm:$0xff]  ;;  %v236_v3 = vld [vmem:[#allocation5 + $0x8] sm:$0xff]  ;;  %s326_s13 = sshll.u32 %s230_s29, 4  ;;  %s830_s26 = scalar_lea.hbm %s880_s4, %s426_s25  ;;  %s832_s13 = int_to_ptr.vmem [resolvable:$true] %s326_s13 }
  0x57   : > { %v239_v4 = vadd.f32 %v235_v2, %v231_v0  ;;  %v234_v6 = vld [vmem:[%s202_s12 + $0x18] sm:$0xff]  ;;  %v240_v7 = vadd.f32 %v236_v3, %v232_v1  ;;  %v237_v8 = vld [vmem:[#allocation5 + $0x10] sm:$0xff]  ;;  %v279_v34 = vshrl.u32 %v278_v30, 7  ;;  %v276_v38 = vld [vmem:[%s878_s2] sm:$0x3]  ;;  %s313_s19 = scalar_lea.sflag [#allocation4], %s804_s14 }
  0x58   : > { %v238_v9 = vld [vmem:[#allocation5 + $0x18] sm:$0xff]  ;;  %v241_v10 = vadd.f32 %v237_v8, %v233_v5  ;;  %v292_v39 = vld [vmem:[%s879_s3] sm:$0x3]  ;;  %s550_s11 = scalar_lea.vmem %s832_s13, 512  ;;  %s626_s28 = smov [#allocation7]  }
  0x59   : > { %v242_v11 = vadd.f32 %v238_v9, %v234_v6  ;;  %v243_v12 = vadd.f32 %v240_v7, %v239_v4  ;;  %v280_v36 = vsub.s32 0, %v279_v34  ;;  %v284_v37 = vsub.s32 1, %v279_v34  ;;  %p551_p4 = scmp.ne.s32.totalorder %s832_s13, %s550_s11  ;;  %s554_s30 = sshll.u32 %s626_s28, 4  ;;  %s555_s30 = int_to_ptr.vmem [resolvable:$false] %s554_s30 }
  0x5a   : > { %s556_s5 = scalar_lea.vmem %s555_s30, 1024  ;;  %p557_p10 = scmp.lt.s32.totalorder %s832_s13, %s555_s30 }
  0x5b   : > { %244 = vadd.xlane.f32.xlu0 %v243_v12  ;;  %v246_v13 = vadd.f32 %v242_v11, %v241_v10  ;;  %v281_v40 = vrot.slane %v276_v38, %v280_v36  ;;  %v285_v41 = vrot.slane %v276_v38, %v284_v37  ;;  %v297_v43 = vrot.slane %v292_v39, %v280_v36  ;;  %p552_p6 = pnand %p551_p4, %p753_p13  ;;  %p558_p3 = scmp.lt.s32.totalorder %s556_s5, %s550_s11 }
  0x5c   : > { %v301_v44 = vrot.slane %v292_v39, %v284_v37 }
  0x5d   : > { %p553_p8 = pneg %p552_p6  ;;  %p559_p7 = por %p558_p3, %p557_p10 }
  0x5f   : > { %247 = vadd.xlane.f32.xlu0 %v246_v13  ;;  %p560_p12 = pnand %p559_p7, %p553_p8 }
  0xe8   : > { %v245_v14 = vpop.xlane.xlu0 %244 }
  0xe9   : > { %v250_v15 = vmul.f32 0.00390625, %v245_v14 }
  0xeb   : > { %v252_v16 = vsub.f32 %v239_v4, %v250_v15  ;;  %v253_v17 = vsub.f32 %v240_v7, %v250_v15 }
  0xec   : > { %v248_v18 = vpop.xlane.xlu0 %247 }
  0xed   : > { %v251_v19 = vmul.f32 0.00390625, %v248_v18  ;;  %v256_v20 = vmul.f32 %v252_v16, %v252_v16  ;;  %v257_v21 = vmul.f32 %v253_v17, %v253_v17 }
  0xef   : > { %v254_v22 = vsub.f32 %v241_v10, %v251_v19  ;;  %v255_v23 = vsub.f32 %v242_v11, %v251_v19  ;;  %v260_v24 = vadd.f32 %v257_v21, %v256_v20 }
  0xf1   : > { %261 = vadd.xlane.f32.xlu1 %v260_v24  ;;  %v258_v25 = vmul.f32 %v254_v22, %v254_v22  ;;  %v259_v26 = vmul.f32 %v255_v23, %v255_v23 }
  0xf3   : > { %v263_v27 = vadd.f32 %v259_v26, %v258_v25 }
  0xf5   : > { %264 = vadd.xlane.f32.xlu1 %v263_v27 }
 0x17e   : > { %v262_v28 = vpop.xlane.xlu1 %261 }
 0x17f   : > { %v266_v29 = vmul.f32 0.00390625, %v262_v28 }
 0x181   : > { %v268_v31 = vadd.f32 1e-05, %v266_v29 }
 0x182   : > { %v265_v32 = vpop.xlane.xlu1 %264 }
 0x183   : > { %488 = vrsqrt.f32 %v268_v31  ;;  %v267_v33 = vmul.f32 0.00390625, %v265_v32 }
 0x185   : > { %v269_v35 = vadd.f32 1e-05, %v267_v33 }
 0x187   : > { %490 = vrsqrt.f32 %v269_v35 }
 0x18d   : > { %v489_v42 = vpop.eup %488 }
 0x18e   : > { %v272_v45 = vmul.f32 %v489_v42, %v252_v16  ;;  %v273_v46 = vmul.f32 %v489_v42, %v253_v17 }
 0x190   : > { %v288_v47 = vmul.f32 %v281_v40, %v272_v45  ;;  %v289_v48 = vmul.f32 %v285_v41, %v273_v46 }
 0x191   : > { %v491_v49 = vpop.eup %490 }
 0x192   : > { %v304_v50 = vadd.f32 %v297_v43, %v288_v47  ;;  %v305_v51 = vadd.f32 %v301_v44, %v289_v48  ;;  %v274_v52 = vmul.f32 %v491_v49, %v254_v22  ;;  %v275_v53 = vmul.f32 %v491_v49, %v255_v23 }
 0x194   : > { %308 = vst [vmem:[%s230_s29] sm:$0xff] %v304_v50  ;;  %309 = vst [vmem:[%s230_s29 + $0x8] sm:$0xff] %v305_v51  ;;  %v290_v54 = vmul.f32 %v281_v40, %v274_v52  ;;  %v291_v55 = vmul.f32 %v285_v41, %v275_v53 }
 0x196   : > { %v306_v56 = vadd.f32 %v297_v43, %v290_v54  ;;  %v307_v57 = vadd.f32 %v301_v44, %v291_v55 }
 0x198   : > { %310 = vst [vmem:[%s230_s29 + $0x10] sm:$0xff] %v306_v56  ;;  %311 = vst [vmem:[%s230_s29 + $0x18] sm:$0xff] %v307_v57 }
 0x199   : > { %563 = shalt.err (!%p560_p12)
}
 0x19a   : > { %s564_s8 = scalar_lea.hbm %s830_s26, 512  ;;  %s568_s23 = scalar_lea.hbm %s880_s4, 1024 }
 0x19b   : > { %p565_p0 = scmp.ne.s32.totalorder %s830_s26, %s564_s8  ;;  %p569_p9 = scmp.lt.u32.totalorder %s830_s26, %s880_s4 }
 0x19c   : > { %p570_p11 = scmp.lt.u32.totalorder %s568_s23, %s564_s8  ;;  %p572_p4 = scmp.lt.u32.totalorder %s564_s8, %s830_s26 }
 0x19d   : > { %p566_p1 = pnand %p565_p0, %p753_p13 }
 0x19e   : > { %p571_p2 = por %p570_p11, %p569_p9 }
 0x19f   : > { %p567_p5 = pneg %p566_p1 }
 0x1a0   : > { %p573_p6 = por %p572_p4, %p571_p2 }
 0x1a2   : > { %p574_p8 = pnand %p573_p6, %p567_p5 }
 0x1a4   : > { %577 = shalt.err (!%p574_p8)
}
 0x1a5   : > { %s627_s25 = smov 256   ;;  %s628_s29 = smov 16  }
 0x1a6   : > { %433 = dma.vmem_to_hbm [thread:$0]  (%p753_p13), %s832_s13, 512, %s830_s26, %s313_s19, %s627_s25, %s627_s25, %s628_s29  }
 0x1a7 PF: > { %s341_s9 = sand.u32 1, %s608_s15   ;;  %p895_p10 = scmp.ne.s32.totalorder %s885_s22, 0 }
 0x1a8   : > { %p896_p3 = scmp.ge.s32.totalorder %s620_s18, 2  ;;  %s342_s10 = scalar_lea.sflag [#allocation4], %s341_s9 }
 0x1aa   : > { %p444_p7 = pnand %p896_p3, %p895_p10 }
 0x1ac   : > { %603 = dma.done.wait (!%p444_p7), %s342_s10, 512  }
 0x1ad   : > { %605 = vsyncadd (!%p444_p7), %s342_s10, 4294966784  ;;  %p18_p12 = scmp.ge.s32.totalorder %s710_s27, 4   ;;  %s897_s15 = smov %s612_s16 }
 0x1ae   : > { %s898_s16 = smov %s616_s17  ;;  %s899_s17 = smov %s749_s6 }
 0x1af   : > { %s900_s18 = smov %s710_s27  ;;  %20 = sbr.rel (!%p18_p12) target bundleno = 6 (0x6), region = 85 }
 0x1b6   :  { %347 = vsyncpa [#allocation3], 1 }
 0x1b7   :  { %349 = vsyncpa [#allocation3 + $0x1], 1 }
 0x1b8   :  { %350 = vsyncpa [#allocation6], 1 }
 0x1b9   :  { %351 = vsyncpa [#allocation4], 1 }
 0x1ba   :  { %353 = vsyncpa [#allocation4 + $0x1], 1 }

</bundles_post_ra>
